<compile_context>
chip_gen: v5e
topology: v5e:2x2
jax: 0.10.0
libtpu: 0.0.40
codegen_flags: <defaults>
</compile_context>

<pallas_src>
import jax
import jax.numpy as jnp
from jax.experimental import pallas as pl
from jax.experimental.pallas import tpu as pltpu


def _round_up(x, m):
    return (x + m - 1) // m * m


def _sublane_multiple(dtype):
    # f32 -> 8, bf16 -> 16, int8/fp8 -> 32
    return max(8, 32 // jnp.dtype(dtype).itemsize)


def _bart_cls_head_kernel(x_ref, w1_ref, b1_ref, w2_ref, b2_ref, out_ref):
    # dense: x @ W1 + b1   (W1 already transposed to [in, inner] in the wrapper)
    h = jnp.dot(x_ref[...], w1_ref[...], preferred_element_type=jnp.float32)
    h = jnp.tanh(h + b1_ref[...])                      # EUP transcendental
    # out_proj: h @ W2 + b2 (W2 transposed to [inner, classes_padded])
    o = jnp.dot(h.astype(w2_ref.dtype), w2_ref[...],
                preferred_element_type=jnp.float32)
    out_ref[...] = (o + b2_ref[...]).astype(out_ref.dtype)


def bart_classification_head(hidden_states, params, *, block_rows=512,
                             compute_dtype=jnp.bfloat16):
    """Fused BartClassificationHead forward (inference).

    hidden_states : (..., input_dim)
    params        : dict with
        w_dense : (inner_dim, input_dim)   # PyTorch nn.Linear layout [out, in]
        b_dense : (inner_dim,)
        w_out   : (num_classes, inner_dim)
        b_out   : (num_classes,)
    Returns (..., num_classes) float32 logits.
    """
    # TODO(synk): pooler_dropout is not applied (training=False => identity).
    *lead, d_in = hidden_states.shape
    x = hidden_states.reshape(-1, d_in)
    n = x.shape[0]

    d_inner = params["w_dense"].shape[0]
    n_cls = params["w_out"].shape[0]

    # Pre-transpose weights once outside the kernel (no XLU .T inside) and cast
    # the MXU operands to the compute dtype (bf16 by default); biases stay f32.
    w1 = jnp.asarray(params["w_dense"]).T.astype(compute_dtype)   # (d_in, d_inner)
    w2 = jnp.asarray(params["w_out"]).T.astype(compute_dtype)     # (d_inner, n_cls)
    b1 = jnp.asarray(params["b_dense"]).astype(jnp.float32).reshape(1, d_inner)
    b2 = jnp.asarray(params["b_out"]).astype(jnp.float32).reshape(1, n_cls)
    x = x.astype(compute_dtype)

    # Pad class dim to a multiple of 128 -> lane-dense (unmasked) output stores.
    c_pad = _round_up(n_cls, 128)
    if c_pad != n_cls:
        w2 = jnp.pad(w2, ((0, 0), (0, c_pad - n_cls)))
        b2 = jnp.pad(b2, ((0, 0), (0, c_pad - n_cls)))

    # Balanced row tiling, rounded to the compute dtype's sublane multiple.
    sub = _sublane_multiple(compute_dtype)
    n_eff = max(n, 1)
    num_tiles = pl.cdiv(n_eff, block_rows)
    tm = _round_up(pl.cdiv(n_eff, num_tiles), sub)
    n_pad = _round_up(n_eff, tm)
    if n_pad != n:
        x = jnp.pad(x, ((0, n_pad - n), (0, 0)))
    grid = n_pad // tm

    itemsize = jnp.dtype(compute_dtype).itemsize
    cost = pl.CostEstimate(
        flops=2 * n_pad * d_in * d_inner + 2 * n_pad * d_inner * c_pad,
        transcendentals=n_pad * d_inner,
        bytes_accessed=(n_pad * d_in * itemsize            # x
                        + d_in * d_inner * itemsize        # W1
                        + d_inner * c_pad * itemsize       # W2
                        + (d_inner + c_pad) * 4            # biases (f32)
                        + n_pad * c_pad * 4),              # logits (f32)
    )

    def build_and_run(single_buffer_consts):
        const_kwargs = ({"pipeline_mode": pl.Buffered(1)}
                        if single_buffer_consts else {})
        const2 = lambda i: (0, 0)
        in_specs = [
            pl.BlockSpec((tm, d_in), lambda i: (i, 0)),                  # x tile
            pl.BlockSpec((d_in, d_inner), const2, **const_kwargs),      # W1^T
            pl.BlockSpec((1, d_inner), const2, **const_kwargs),         # b1
            pl.BlockSpec((d_inner, c_pad), const2, **const_kwargs),     # W2^T
            pl.BlockSpec((1, c_pad), const2, **const_kwargs),           # b2
        ]
        return pl.pallas_call(
            _bart_cls_head_kernel,
            out_shape=jax.ShapeDtypeStruct((n_pad, c_pad), jnp.float32),
            grid_spec=pltpu.PrefetchScalarGridSpec(
                num_scalar_prefetch=0,
                grid=(grid,),
                in_specs=in_specs,
                out_specs=pl.BlockSpec((tm, c_pad), lambda i: (i, 0)),
            ),
            compiler_params=pltpu.CompilerParams(
                dimension_semantics=("parallel",),
                vmem_limit_bytes=32 * 1024 * 1024),
            cost_estimate=cost,
        )(x, w1, b1, w2, b2)

    try:
        # Preferred: constants single-buffered (no wasted VMEM for blocks that
        # never change across the grid).
        out = build_and_run(True)
    except Exception:
        # Fallback for jax versions where pipeline_mode=pl.Buffered(1) is not
        # accepted on a top-level pallas_call BlockSpec.
        out = build_and_run(False)

    out = out[:n, :n_cls]
    return out.reshape(*lead, n_cls)


def _reference(hidden_states, params):
    """Plain-JAX f32 reference mirroring the PyTorch forward (dropout = identity)."""
    h = jnp.tanh(hidden_states @ params["w_dense"].T + params["b_dense"])
    return h @ params["w_out"].T + params["b_out"]


if __name__ == "__main__":
    # Small, module-consistent shapes: 16 pooled sentence vectors, hidden=32,
    # inner=32, 8 classes (class dim padded to 128 inside the wrapper).
    N, D_IN, D_INNER, N_CLS = 16, 32, 32, 8

    key = jax.random.PRNGKey(0)
    keys = jax.random.split(key, 3)
    hidden = jax.random.normal(keys[0], (N, D_IN), dtype=jnp.float32)

    def init_linear(k, fan_in, fan_out):
        kw, kb = jax.random.split(k)
        bound = 1.0 / (fan_in ** 0.5)
        w = jax.random.uniform(kw, (fan_out, fan_in), jnp.float32, -bound, bound)
        b = jax.random.uniform(kb, (fan_out,), jnp.float32, -bound, bound)
        return w, b

    w_dense, b_dense = init_linear(keys[1], D_IN, D_INNER)
    w_out, b_out = init_linear(keys[2], D_INNER, N_CLS)
    params = dict(w_dense=w_dense, b_dense=b_dense, w_out=w_out, b_out=b_out)

    ref = _reference(hidden, params)

    # Default bf16-compute path (f32 accumulation) -- modest tolerance.
    out_bf16 = bart_classification_head(hidden, params)
    out_bf16 = jax.block_until_ready(out_bf16)
    assert out_bf16.shape == (N, N_CLS), f"bad shape {out_bf16.shape}"
    assert jnp.allclose(out_bf16, ref, atol=5e-2, rtol=5e-2), "bf16 output mismatch"

    # Exact f32 compute path -- tight tolerance against the f32 reference.
    out_f32 = bart_classification_head(hidden, params, compute_dtype=jnp.float32)
    out_f32 = jax.block_until_ready(out_f32)
    assert out_f32.shape == (N, N_CLS), f"bad shape {out_f32.shape}"
    assert jnp.allclose(out_f32, ref, atol=1e-5, rtol=1e-5), "f32 output mismatch"

    print("KERNEL_OK")
</pallas_src>

<mosaic_0001>
module attributes {stable_mosaic.version = 11 : i64} {
  func.func @_bart_cls_head_kernel(%arg0: i32, %arg1: memref<16x32xbf16, #tpu.memory_space<vmem>>, %arg2: memref<32x32xbf16, #tpu.memory_space<vmem>>, %arg3: memref<1x32xf32, #tpu.memory_space<vmem>>, %arg4: memref<32x128xbf16, #tpu.memory_space<vmem>>, %arg5: memref<1x128xf32, #tpu.memory_space<vmem>>, %arg6: memref<16x128xf32, #tpu.memory_space<vmem>>) attributes {dimension_semantics = [#tpu.dimension_semantics<parallel>], iteration_bounds = array<i64: 1>, scalar_prefetch = 0 : i64, scratch_operands = 0 : i64, tpu.core_type = #tpu.core_type<tc>, window_params = [{transform_indices = @transform_0, window_bounds = array<i64: 16, 32>}, {pipeline_mode = #tpu.pipeline_mode<synchronous>, transform_indices = @transform_1, window_bounds = array<i64: 32, 32>}, {pipeline_mode = #tpu.pipeline_mode<synchronous>, transform_indices = @transform_2, window_bounds = array<i64: 1, 32>}, {pipeline_mode = #tpu.pipeline_mode<synchronous>, transform_indices = @transform_3, window_bounds = array<i64: 32, 128>}, {pipeline_mode = #tpu.pipeline_mode<synchronous>, transform_indices = @transform_4, window_bounds = array<i64: 1, 128>}, {transform_indices = @transform_5, window_bounds = array<i64: 16, 128>}]} {
    %c0 = arith.constant 0 : index
    %c0_0 = arith.constant 0 : index
    %0 = vector.load %arg1[%c0, %c0_0] : memref<16x32xbf16, #tpu.memory_space<vmem>>, vector<16x32xbf16>
    %c0_1 = arith.constant 0 : index
    %c0_2 = arith.constant 0 : index
    %1 = vector.load %arg2[%c0_1, %c0_2] : memref<32x32xbf16, #tpu.memory_space<vmem>>, vector<32x32xbf16>
    %cst = arith.constant dense<0.000000e+00> : vector<16x32xf32>
    %2 = tpu.matmul %0, %1, %cst {dimension_numbers = #tpu.dot_dimension_numbers<[1], [0], [0], [1], [0, 0, 1, 1], [], []>} : vector<16x32xbf16>, vector<32x32xbf16>, vector<16x32xf32> -> vector<16x32xf32>
    %c0_3 = arith.constant 0 : index
    %c0_4 = arith.constant 0 : index
    %3 = vector.load %arg3[%c0_3, %c0_4] : memref<1x32xf32, #tpu.memory_space<vmem>>, vector<1x32xf32>
    %4 = vector.broadcast %3 : vector<1x32xf32> to vector<16x32xf32>
    %5 = arith.addf %2, %4 : vector<16x32xf32>
    %6 = math.tanh %5 : vector<16x32xf32>
    %7 = arith.truncf %6 : vector<16x32xf32> to vector<16x32xbf16>
    %c0_5 = arith.constant 0 : index
    %c0_6 = arith.constant 0 : index
    %8 = vector.load %arg4[%c0_5, %c0_6] : memref<32x128xbf16, #tpu.memory_space<vmem>>, vector<32x128xbf16>
    %cst_7 = arith.constant dense<0.000000e+00> : vector<16x128xf32>
    %9 = tpu.matmul %7, %8, %cst_7 {dimension_numbers = #tpu.dot_dimension_numbers<[1], [0], [0], [1], [0, 0, 1, 1], [], []>} : vector<16x32xbf16>, vector<32x128xbf16>, vector<16x128xf32> -> vector<16x128xf32>
    %c0_8 = arith.constant 0 : index
    %c0_9 = arith.constant 0 : index
    %10 = vector.load %arg5[%c0_8, %c0_9] : memref<1x128xf32, #tpu.memory_space<vmem>>, vector<1x128xf32>
    %11 = vector.broadcast %10 : vector<1x128xf32> to vector<16x128xf32>
    %12 = arith.addf %9, %11 : vector<16x128xf32>
    %c0_10 = arith.constant 0 : index
    %c0_11 = arith.constant 0 : index
    %13 = vector.load %arg6[%c0_10, %c0_11] : memref<16x128xf32, #tpu.memory_space<vmem>>, vector<16x128xf32>
    tpu.vector_store %arg6[%c0_10, %c0_11], %12 {strides = array<i32>} : memref<16x128xf32, #tpu.memory_space<vmem>>, vector<16x128xf32>,
    return
  }
  func.func @transform_0(%arg0: i32) -> (i32, i32) {
    %c0_i32 = arith.constant 0 : i32
    %c0_i32_0 = arith.constant 0 : i32
    return %arg0, %c0_i32 : i32, i32
  }
  func.func @transform_1(%arg0: i32) -> (i32, i32) {
    %c0_i32 = arith.constant 0 : i32
    %c0_i32_0 = arith.constant 0 : i32
    %c0_i32_1 = arith.constant 0 : i32
    return %c0_i32, %c0_i32_0 : i32, i32
  }
  func.func @transform_2(%arg0: i32) -> (i32, i32) {
    %c0_i32 = arith.constant 0 : i32
    %c0_i32_0 = arith.constant 0 : i32
    %c0_i32_1 = arith.constant 0 : i32
    return %c0_i32, %c0_i32_0 : i32, i32
  }
  func.func @transform_3(%arg0: i32) -> (i32, i32) {
    %c0_i32 = arith.constant 0 : i32
    %c0_i32_0 = arith.constant 0 : i32
    %c0_i32_1 = arith.constant 0 : i32
    return %c0_i32, %c0_i32_0 : i32, i32
  }
  func.func @transform_4(%arg0: i32) -> (i32, i32) {
    %c0_i32 = arith.constant 0 : i32
    %c0_i32_0 = arith.constant 0 : i32
    %c0_i32_1 = arith.constant 0 : i32
    return %c0_i32, %c0_i32_0 : i32, i32
  }
  func.func @transform_5(%arg0: i32) -> (i32, i32) {
    %c0_i32 = arith.constant 0 : i32
    %c0_i32_0 = arith.constant 0 : i32
    return %arg0, %c0_i32 : i32, i32
  }
}

module attributes {stable_mosaic.version = 11 : i64} {
  func.func @_bart_cls_head_kernel(%arg0: i32, %arg1: memref<16x32xbf16, #tpu.memory_space<vmem>>, %arg2: memref<32x32xbf16, #tpu.memory_space<vmem>>, %arg3: memref<1x32xf32, #tpu.memory_space<vmem>>, %arg4: memref<32x128xbf16, #tpu.memory_space<vmem>>, %arg5: memref<1x128xf32, #tpu.memory_space<vmem>>, %arg6: memref<16x128xf32, #tpu.memory_space<vmem>>) attributes {dimension_semantics = [#tpu.dimension_semantics<parallel>], iteration_bounds = array<i64: 1>, scalar_prefetch = 0 : i64, scratch_operands = 0 : i64, tpu.core_type = #tpu.core_type<tc>, window_params = [{transform_indices = @transform_0, window_bounds = array<i64: 16, 32>}, {pipeline_mode = #tpu.pipeline_mode<synchronous>, transform_indices = @transform_1, window_bounds = array<i64: 32, 32>}, {pipeline_mode = #tpu.pipeline_mode<synchronous>, transform_indices = @transform_2, window_bounds = array<i64: 1, 32>}, {pipeline_mode = #tpu.pipeline_mode<synchronous>, transform_indices = @transform_3, window_bounds = array<i64: 32, 128>}, {pipeline_mode = #tpu.pipeline_mode<synchronous>, transform_indices = @transform_4, window_bounds = array<i64: 1, 128>}, {transform_indices = @transform_5, window_bounds = array<i64: 16, 128>}]} {
    %c0 = arith.constant 0 : index
    %c0_0 = arith.constant 0 : index
    %0 = vector.load %arg1[%c0, %c0_0] : memref<16x32xbf16, #tpu.memory_space<vmem>>, vector<16x32xbf16>
    %c0_1 = arith.constant 0 : index
    %c0_2 = arith.constant 0 : index
    %1 = vector.load %arg2[%c0_1, %c0_2] : memref<32x32xbf16, #tpu.memory_space<vmem>>, vector<32x32xbf16>
    %cst = arith.constant dense<0.000000e+00> : vector<16x32xf32>
    %2 = tpu.matmul %0, %1, %cst {dimension_numbers = #tpu.dot_dimension_numbers<[1], [0], [0], [1], [0, 0, 1, 1], [], []>} : vector<16x32xbf16>, vector<32x32xbf16>, vector<16x32xf32> -> vector<16x32xf32>
    %c0_3 = arith.constant 0 : index
    %c0_4 = arith.constant 0 : index
    %3 = vector.load %arg3[%c0_3, %c0_4] : memref<1x32xf32, #tpu.memory_space<vmem>>, vector<1x32xf32>
    %4 = vector.broadcast %3 : vector<1x32xf32> to vector<16x32xf32>
    %5 = arith.addf %2, %4 : vector<16x32xf32>
    %6 = math.tanh %5 : vector<16x32xf32>
    %7 = arith.truncf %6 : vector<16x32xf32> to vector<16x32xbf16>
    %c0_5 = arith.constant 0 : index
    %c0_6 = arith.constant 0 : index
    %8 = vector.load %arg4[%c0_5, %c0_6] : memref<32x128xbf16, #tpu.memory_space<vmem>>, vector<32x128xbf16>
    %cst_7 = arith.constant dense<0.000000e+00> : vector<16x128xf32>
    %9 = tpu.matmul %7, %8, %cst_7 {dimension_numbers = #tpu.dot_dimension_numbers<[1], [0], [0], [1], [0, 0, 1, 1], [], []>} : vector<16x32xbf16>, vector<32x128xbf16>, vector<16x128xf32> -> vector<16x128xf32>
    %c0_8 = arith.constant 0 : index
    %c0_9 = arith.constant 0 : index
    %10 = vector.load %arg5[%c0_8, %c0_9] : memref<1x128xf32, #tpu.memory_space<vmem>>, vector<1x128xf32>
    %11 = vector.broadcast %10 : vector<1x128xf32> to vector<16x128xf32>
    %12 = arith.addf %9, %11 : vector<16x128xf32>
    %c0_10 = arith.constant 0 : index
    %c0_11 = arith.constant 0 : index
    %13 = vector.load %arg6[%c0_10, %c0_11] : memref<16x128xf32, #tpu.memory_space<vmem>>, vector<16x128xf32>
    tpu.vector_store %arg6[%c0_10, %c0_11], %12 {strides = array<i32>} : memref<16x128xf32, #tpu.memory_space<vmem>>, vector<16x128xf32>,
    return
  }
  func.func @transform_0(%arg0: i32) -> (i32, i32) {
    %c0_i32 = arith.constant 0 : i32
    %c0_i32_0 = arith.constant 0 : i32
    return %arg0, %c0_i32 : i32, i32
  }
  func.func @transform_1(%arg0: i32) -> (i32, i32) {
    %c0_i32 = arith.constant 0 : i32
    %c0_i32_0 = arith.constant 0 : i32
    %c0_i32_1 = arith.constant 0 : i32
    return %c0_i32, %c0_i32_0 : i32, i32
  }
  func.func @transform_2(%arg0: i32) -> (i32, i32) {
    %c0_i32 = arith.constant 0 : i32
    %c0_i32_0 = arith.constant 0 : i32
    %c0_i32_1 = arith.constant 0 : i32
    return %c0_i32, %c0_i32_0 : i32, i32
  }
  func.func @transform_3(%arg0: i32) -> (i32, i32) {
    %c0_i32 = arith.constant 0 : i32
    %c0_i32_0 = arith.constant 0 : i32
    %c0_i32_1 = arith.constant 0 : i32
    return %c0_i32, %c0_i32_0 : i32, i32
  }
  func.func @transform_4(%arg0: i32) -> (i32, i32) {
    %c0_i32 = arith.constant 0 : i32
    %c0_i32_0 = arith.constant 0 : i32
    %c0_i32_1 = arith.constant 0 : i32
    return %c0_i32, %c0_i32_0 : i32, i32
  }
  func.func @transform_5(%arg0: i32) -> (i32, i32) {
    %c0_i32 = arith.constant 0 : i32
    %c0_i32_0 = arith.constant 0 : i32
    return %arg0, %c0_i32 : i32, i32
  }
}

</mosaic_0001>

<bundles_post_ra>
// kernel: tpu_custom_call.1
= control target key start
LH: loop header
LB: loop body
LE: loop exit
PB: predicated region body
PF: predicated region fallthrough
CT: control target
= control target key end

     0   :  { %10 = vsyncpa [#allocation3], 0  ;;  %s377_s0 = inlined_call_operand.hbm [shape: bf16[16,32], index: 0, kind: input, shape index: {}]   ;;  %s378_s1 = inlined_call_operand.hbm [shape: bf16[32,32], index: 1, kind: input, shape index: {}]   ;;  %s379_s2 = inlined_call_operand.vmem [shape: f32[1,32], index: 2, kind: input, shape index: {}]   ;;  %s380_s3 = inlined_call_operand.hbm [shape: bf16[32,128], index: 3, kind: input, shape index: {}]   ;;  %s381_s4 = inlined_call_operand.vmem [shape: f32[1,128], index: 4, kind: input, shape index: {}]   ;;  %s382_s5 = inlined_call_operand.hbm [shape: f32[16,128], index: 5, kind: output, shape index: {}]  }
   0x1   :  { %11 = vsyncpa [#allocation6], 0 }
   0x2   :  { %12 = vsyncpa [#allocation4], 0  ;;  %s30_s20 = sshll.u32 %s378_s1, 4  ;;  %s319_s21 = smov [#allocation5]   ;;  %s31_s20 = int_to_ptr.hbm [resolvable:$true] %s30_s20 }
   0x3   :  { %s32_s22 = sshll.u32 %s319_s21, 4  ;;  %s17_s25 = sshll.u32 %s377_s0, 4  ;;  %s33_s22 = int_to_ptr.vmem [resolvable:$true] %s32_s22  ;;  %s18_s25 = int_to_ptr.hbm [resolvable:$true] %s17_s25 }
   0x4   :  { %s320_s26 = smov 64   ;;  %s321_s27 = smov 4  }
   0x5   :  { %38 = dma.hbm_to_vmem [thread:$0]  %s31_s20, 256, %s33_s22, [#allocation6], %s320_s26, %s320_s26, %s321_s27  }
   0x6   :  { %s322_s28 = smov [#allocation2]   ;;  %s45_s7 = sshll.u32 %s380_s3, 4  ;;  %s46_s7 = int_to_ptr.hbm [resolvable:$true] %s45_s7 }
   0x7   :  { %s19_s29 = sshll.u32 %s322_s28, 4  ;;  %s323_s1 = smov [#allocation7]   ;;  %s20_s29 = int_to_ptr.vmem [resolvable:$true] %s19_s29 }
   0x8   :  { %25 = dma.hbm_to_vmem [thread:$0]  %s18_s25, 128, %s20_s29, [#allocation3], %s320_s26, %s320_s26, %s321_s27  }
   0x9   :  { %s47_s8 = sshll.u32 %s323_s1, 4  ;;  %s48_s8 = int_to_ptr.vmem [resolvable:$true] %s47_s8 }
   0xa   :  { %53 = dma.hbm_to_vmem [thread:$0]  %s46_s7, 256, %s48_s8, [#allocation6], %s320_s26, %s320_s26, %s321_s27  }
   0xb   :  { %313 = dma.done.wait [#allocation3], 128  }
   0xc   :  { %314 = vsyncadd [#allocation3], 4294967168 }
   0xd   :  { %315 = dma.done.wait [#allocation6], 512  }
   0xe   :  { %316 = vsyncadd [#allocation6], 4294966784  ;;  %v200_v0 = vld [vmem:[#allocation5 + $0x8] sm:$0xff]  ;;  %v199_v1 = vld [vmem:[#allocation5] sm:$0xff]  ;;  %vm96_vm0 = vcmask 261120   ;;  %s324_s11 = smov [#allocation8]  }
   0xf   :  { %106 = vmatpush.bf16.msra.mxu0 %v200_v0  ;;  %v198_v2 = vld [vmem:[#allocation2] sm:$0xff]  ;;  %v201_v4 = vld [vmem:[#allocation7] sm:$0xff]  ;;  %s160_s12 = sshll.u32 %s324_s11, 4  ;;  %s162_s14 = sshll.u32 %s382_s5, 4  ;;  %s161_s12 = int_to_ptr.vmem [resolvable:$true] %s160_s12  ;;  %s163_s14 = int_to_ptr.hbm [resolvable:$true] %s162_s14 }
  0x10   :  { %v202_v3 = vld [vmem:[#allocation7 + $0x8] sm:$0xff]  ;;  %s325_s15 = smov 128   ;;  %s326_s16 = smov 8  }
  0x11   :  { %146 = vmatpush.bf16.msra.mxu1 %v202_v3  ;;  %v211_v6 = vld [vmem:[%s379_s2] ss:$0 sm:$0xff] }
  0x12   :  { %v212_v13 = vld [vmem:[%s381_s4] ss:$0 sm:$0xff] }
  0x13   :  { %107 = vmatpush.bf16.msra.mxu0 %v199_v1 }
  0x15   :  { %147 = vmatpush.bf16.msra.mxu1 %v201_v4 }
  0x16   :  { %188 = vmatmul.msk.bf16.vlgmr.msra.gmra.mxu0 %vm96_vm0, %v198_v2 }
  0x93   :  { %v109_v5 = vpop.f32.mrf.mxu0 }
  0x94   :  { %v110_v7 = vadd.f32 %v211_v6, %v109_v5 }
  0x96   :  { %213 = vtanh.f32 %v110_v7 }
  0x9b   :  { %v111_v8 = vpop.f32.mrf.mxu0 }
  0x9c   :  { %v112_v9 = vadd.f32 %v211_v6, %v111_v8  ;;  %v214_v10 = vpop.eup %213 }
  0x9e   :  { %215 = vtanh.f32 %v112_v9 }
  0xa4   :  { %v216_v11 = vpop.eup %215 }
  0xa5   :  { %v116_v12 = vpack.c.bf16 %v216_v11, %v214_v10 }
  0xa7   :  { %197 = vmatmul.msk.bf16.vlgmr.msra.gmra.mxu1 %vm96_vm0, %v116_v12 }
 0x124   :  { %v149_v14 = vpop.f32.mrf.mxu1 }
 0x125   :  { %v150_v15 = vadd.f32 %v212_v13, %v149_v14 }
 0x127   :  { %154 = vst [vmem:[#allocation8] sm:$0xff] %v150_v15 }
 0x12c   :  { %v151_v16 = vpop.f32.mrf.mxu1 }
 0x12d   :  { %v152_v17 = vadd.f32 %v212_v13, %v151_v16 }
 0x12f   :  { %155 = vst [vmem:[#allocation8 + $0x8] sm:$0xff] %v152_v17 }
 0x130   :  { %168 = dma.vmem_to_hbm [thread:$0]  %s161_s12, 256, %s163_s14, [#allocation4], %s325_s15, %s325_s15, %s326_s16  }
 0x131   :  { %317 = dma.done.wait [#allocation4], 256  }
 0x132   :  { %318 = vsyncadd [#allocation4], 4294967040 }
 0x133   :  { %173 = vsyncpa [#allocation3], 1 }
 0x134   :  { %174 = vsyncpa [#allocation6], 1 }
 0x135   :  { %175 = vsyncpa [#allocation4], 1 }

// kernel: tpu_custom_call.1
= control target key start
LH: loop header
LB: loop body
LE: loop exit
PB: predicated region body
PF: predicated region fallthrough
CT: control target
= control target key end

     0   :  { %10 = vsyncpa [#allocation3], 0  ;;  %s377_s0 = inlined_call_operand.hbm [shape: bf16[16,32], index: 0, kind: input, shape index: {}]   ;;  %s378_s1 = inlined_call_operand.hbm [shape: bf16[32,32], index: 1, kind: input, shape index: {}]   ;;  %s379_s2 = inlined_call_operand.vmem [shape: f32[1,32], index: 2, kind: input, shape index: {}]   ;;  %s380_s3 = inlined_call_operand.hbm [shape: bf16[32,128], index: 3, kind: input, shape index: {}]   ;;  %s381_s4 = inlined_call_operand.vmem [shape: f32[1,128], index: 4, kind: input, shape index: {}]   ;;  %s382_s5 = inlined_call_operand.hbm [shape: f32[16,128], index: 5, kind: output, shape index: {}]  }
   0x1   :  { %11 = vsyncpa [#allocation6], 0 }
   0x2   :  { %12 = vsyncpa [#allocation4], 0  ;;  %s30_s20 = sshll.u32 %s378_s1, 4  ;;  %s319_s21 = smov [#allocation5]   ;;  %s31_s20 = int_to_ptr.hbm [resolvable:$true] %s30_s20 }
   0x3   :  { %s32_s22 = sshll.u32 %s319_s21, 4  ;;  %s17_s25 = sshll.u32 %s377_s0, 4  ;;  %s33_s22 = int_to_ptr.vmem [resolvable:$true] %s32_s22  ;;  %s18_s25 = int_to_ptr.hbm [resolvable:$true] %s17_s25 }
   0x4   :  { %s320_s26 = smov 64   ;;  %s321_s27 = smov 4  }
   0x5   :  { %38 = dma.hbm_to_vmem [thread:$0]  %s31_s20, 256, %s33_s22, [#allocation6], %s320_s26, %s320_s26, %s321_s27  }
   0x6   :  { %s322_s28 = smov [#allocation2]   ;;  %s45_s7 = sshll.u32 %s380_s3, 4  ;;  %s46_s7 = int_to_ptr.hbm [resolvable:$true] %s45_s7 }
   0x7   :  { %s19_s29 = sshll.u32 %s322_s28, 4  ;;  %s323_s1 = smov [#allocation7]   ;;  %s20_s29 = int_to_ptr.vmem [resolvable:$true] %s19_s29 }
   0x8   :  { %25 = dma.hbm_to_vmem [thread:$0]  %s18_s25, 128, %s20_s29, [#allocation3], %s320_s26, %s320_s26, %s321_s27  }
   0x9   :  { %s47_s8 = sshll.u32 %s323_s1, 4  ;;  %s48_s8 = int_to_ptr.vmem [resolvable:$true] %s47_s8 }
   0xa   :  { %53 = dma.hbm_to_vmem [thread:$0]  %s46_s7, 256, %s48_s8, [#allocation6], %s320_s26, %s320_s26, %s321_s27  }
   0xb   :  { %313 = dma.done.wait [#allocation3], 128  }
   0xc   :  { %314 = vsyncadd [#allocation3], 4294967168 }
   0xd   :  { %315 = dma.done.wait [#allocation6], 512  }
   0xe   :  { %316 = vsyncadd [#allocation6], 4294966784  ;;  %v200_v0 = vld [vmem:[#allocation5 + $0x8] sm:$0xff]  ;;  %v199_v1 = vld [vmem:[#allocation5] sm:$0xff]  ;;  %vm96_vm0 = vcmask 261120   ;;  %s324_s11 = smov [#allocation8]  }
   0xf   :  { %106 = vmatpush.bf16.msra.mxu0 %v200_v0  ;;  %v198_v2 = vld [vmem:[#allocation2] sm:$0xff]  ;;  %v201_v4 = vld [vmem:[#allocation7] sm:$0xff]  ;;  %s160_s12 = sshll.u32 %s324_s11, 4  ;;  %s162_s14 = sshll.u32 %s382_s5, 4  ;;  %s161_s12 = int_to_ptr.vmem [resolvable:$true] %s160_s12  ;;  %s163_s14 = int_to_ptr.hbm [resolvable:$true] %s162_s14 }
  0x10   :  { %v202_v3 = vld [vmem:[#allocation7 + $0x8] sm:$0xff]  ;;  %s325_s15 = smov 128   ;;  %s326_s16 = smov 8  }
  0x11   :  { %146 = vmatpush.bf16.msra.mxu1 %v202_v3  ;;  %v211_v6 = vld [vmem:[%s379_s2] ss:$0 sm:$0xff] }
  0x12   :  { %v212_v13 = vld [vmem:[%s381_s4] ss:$0 sm:$0xff] }
  0x13   :  { %107 = vmatpush.bf16.msra.mxu0 %v199_v1 }
  0x15   :  { %147 = vmatpush.bf16.msra.mxu1 %v201_v4 }
  0x16   :  { %188 = vmatmul.msk.bf16.vlgmr.msra.gmra.mxu0 %vm96_vm0, %v198_v2 }
  0x93   :  { %v109_v5 = vpop.f32.mrf.mxu0 }
  0x94   :  { %v110_v7 = vadd.f32 %v211_v6, %v109_v5 }
  0x96   :  { %213 = vtanh.f32 %v110_v7 }
  0x9b   :  { %v111_v8 = vpop.f32.mrf.mxu0 }
  0x9c   :  { %v112_v9 = vadd.f32 %v211_v6, %v111_v8  ;;  %v214_v10 = vpop.eup %213 }
  0x9e   :  { %215 = vtanh.f32 %v112_v9 }
  0xa4   :  { %v216_v11 = vpop.eup %215 }
  0xa5   :  { %v116_v12 = vpack.c.bf16 %v216_v11, %v214_v10 }
  0xa7   :  { %197 = vmatmul.msk.bf16.vlgmr.msra.gmra.mxu1 %vm96_vm0, %v116_v12 }
 0x124   :  { %v149_v14 = vpop.f32.mrf.mxu1 }
 0x125   :  { %v150_v15 = vadd.f32 %v212_v13, %v149_v14 }
 0x127   :  { %154 = vst [vmem:[#allocation8] sm:$0xff] %v150_v15 }
 0x12c   :  { %v151_v16 = vpop.f32.mrf.mxu1 }
 0x12d   :  { %v152_v17 = vadd.f32 %v212_v13, %v151_v16 }
 0x12f   :  { %155 = vst [vmem:[#allocation8 + $0x8] sm:$0xff] %v152_v17 }
 0x130   :  { %168 = dma.vmem_to_hbm [thread:$0]  %s161_s12, 256, %s163_s14, [#allocation4], %s325_s15, %s325_s15, %s326_s16  }
 0x131   :  { %317 = dma.done.wait [#allocation4], 256  }
 0x132   :  { %318 = vsyncadd [#allocation4], 4294967040 }
 0x133   :  { %173 = vsyncpa [#allocation3], 1 }
 0x134   :  { %174 = vsyncpa [#allocation6], 1 }
 0x135   :  { %175 = vsyncpa [#allocation4], 1 }

</bundles_post_ra>
